<compile_context>
chip_gen: v7x
topology: tpu7x:2x2x1
jax: 0.10.0
libtpu: 0.0.40
codegen_flags: <defaults>
</compile_context>

<pallas_src>
import math

import jax
import jax.numpy as jnp
from jax.experimental import pallas as pl
from jax.experimental.pallas import tpu as pltpu

LOG_2PI = math.log(2.0 * math.pi)
SIGMA_OBS = 1.0                      # fixed observation noise of the model
INV_SIGMA = 1.0 / SIGMA_OBS
LOG_SIGMA = math.log(SIGMA_OBS)


def _make_kernel(D, N, TN, needs_mask):
    """Build the grid kernel for static (D, N, TN)."""

    def kernel(x_ref, y_ref, loc_ref, raw_scale_ref, eps_ref,
               neg_elbo_ref, entropy_ref, sample_ref, acc_ref):
        n = pl.program_id(0)

        # ---- one-time work: rsample, entropy, prior (constants hoisted) ----
        @pl.when(n == 0)
        def _init():
            raw_scale = raw_scale_ref[...]                       # (1, D)
            sample = loc_ref[...] + jnp.exp(raw_scale) * eps_ref[...]
            sample_ref[...] = sample                             # cache for all tiles
            entropy = 0.5 * (1.0 + LOG_2PI) * D + jnp.sum(raw_scale)
            prior_lp = -0.5 * jnp.sum(sample * sample) - 0.5 * D * LOG_2PI
            entropy_ref[0] = entropy
            acc_ref[0] = prior_lp + entropy                      # once-only terms
            acc_ref[1] = 0.0                                     # running sum(resid^2)

        # ---- per-tile likelihood reduction over this N slab ----
        sample = sample_ref[...]                                 # (1, D)
        mu = jnp.dot(sample.astype(x_ref.dtype), x_ref[...],
                     preferred_element_type=jnp.float32)         # (1, TN) on MXU
        resid = (y_ref[...].astype(jnp.float32) - mu) * INV_SIGMA
        if needs_mask:
            lane = jax.lax.broadcasted_iota(jnp.int32, (1, TN), 1)
            resid = jnp.where(n * TN + lane < N, resid, 0.0)
        acc_ref[1] += jnp.sum(resid * resid)

        # ---- finalize on the last tile ----
        @pl.when(n == pl.num_programs(0) - 1)
        def _finalize():
            like_lp = -0.5 * acc_ref[1] - N * (LOG_SIGMA + 0.5 * LOG_2PI)
            neg_elbo_ref[0] = -(acc_ref[0] + like_lp)

    return kernel


def variational_loss(x_dn, y_1n, loc_1d, raw_scale_1d, eps_1d, *, tn=512):
    """Returns (-elbo, entropy) as f32 scalars.

    x_dn: (D, N) design matrix (feature-major; f32 or bf16).
    y_1n: (1, N) observations.  loc/raw_scale/eps: (1, D) variational params & noise.
    tn:   N-tile width (multiple of 128); size it per generation's VMEM budget.
    """
    D, N = x_dn.shape
    assert y_1n.shape == (1, N)
    assert loc_1d.shape == (1, D) and raw_scale_1d.shape == (1, D)
    assert eps_1d.shape == (1, D)

    if N <= tn:
        TN = N                      # single full-array block (no 128 requirement)
    else:
        assert tn % 128 == 0, "tile width must be a multiple of 128 lanes"
        TN = tn
    num_tiles = pl.cdiv(N, TN)
    needs_mask = (N % TN) != 0

    kernel = _make_kernel(D, N, TN, needs_mask)
    smem = pltpu.MemorySpace.SMEM

    cost = pl.CostEstimate(
        flops=2 * D * N + 4 * N + 10 * D,
        transcendentals=D,
        bytes_accessed=int(x_dn.dtype.itemsize) * D * N + 4 * (N + 3 * D + 2),
    )

    # TODO(synk): on v7x, split the N reduction across the 2 TensorCores
    # (per-core partial like_lp combined afterwards); single-TC stream here.
    neg_elbo, entropy = pl.pallas_call(
        kernel,
        out_shape=(jax.ShapeDtypeStruct((1,), jnp.float32),
                   jax.ShapeDtypeStruct((1,), jnp.float32)),
        grid=(num_tiles,),
        in_specs=[
            pl.BlockSpec((D, TN), lambda n: (0, n)),      # X: streamed over N
            pl.BlockSpec((1, TN), lambda n: (0, n)),      # y: streamed over N
            pl.BlockSpec((1, D), lambda n: (0, 0)),       # loc: resident
            pl.BlockSpec((1, D), lambda n: (0, 0)),       # raw_scale: resident
            pl.BlockSpec((1, D), lambda n: (0, 0)),       # eps: resident
        ],
        out_specs=(pl.BlockSpec((1,), lambda n: (0,), memory_space=smem),
                   pl.BlockSpec((1,), lambda n: (0,), memory_space=smem)),
        scratch_shapes=[
            pltpu.VMEM((1, D), jnp.float32),              # cached rsample
            pltpu.SMEM((2,), jnp.float32),                # [prior+entropy, sum resid^2]
        ],
        compiler_params=pltpu.CompilerParams(
            dimension_semantics=(pltpu.ARBITRARY,)),      # N axis is a reduction
        cost_estimate=cost,
    )(x_dn, y_1n, loc_1d, raw_scale_1d, eps_1d)
    return neg_elbo[0], entropy[0]


def reference_variational_loss(x_dn, y_1n, loc_1d, raw_scale_1d, eps_1d):
    scale = jnp.exp(raw_scale_1d)
    sample = loc_1d + scale * eps_1d
    entropy = jnp.sum(0.5 * (1.0 + LOG_2PI) + raw_scale_1d)
    prior_lp = jnp.sum(-0.5 * sample * sample - 0.5 * LOG_2PI)
    mu = sample.astype(jnp.float32) @ x_dn.astype(jnp.float32)
    resid = (y_1n - mu) / SIGMA_OBS
    like_lp = jnp.sum(-0.5 * resid * resid
                      - jnp.log(jnp.float32(SIGMA_OBS)) - 0.5 * LOG_2PI)
    elbo = prior_lp + like_lp + entropy
    return -elbo, entropy


if __name__ == "__main__":
    def make_inputs(key, D, N):
        k_x, k_y, k_loc, k_eps = jax.random.split(key, 4)
        x_dn = jax.random.normal(k_x, (D, N), dtype=jnp.float32)       # (D, N)
        y_1n = jax.random.normal(k_y, (1, N), dtype=jnp.float32)
        loc_1d = 0.1 * jax.random.normal(k_loc, (1, D), dtype=jnp.float32)
        raw_scale_1d = jnp.full((1, D), -0.5, dtype=jnp.float32)
        eps_1d = jax.random.normal(k_eps, (1, D), dtype=jnp.float32)
        return x_dn, y_1n, loc_1d, raw_scale_1d, eps_1d

    key = jax.random.PRNGKey(0)
    k1, k2 = jax.random.split(key)

    # Case 1: tiled streaming path with a ragged (masked) last tile:
    #   D=32, N=640, TN=256 -> 3 grid steps, last tile half-valid.
    args1 = make_inputs(k1, 32, 640)
    out1 = jax.block_until_ready(variational_loss(*args1, tn=256))
    ref1 = reference_variational_loss(*args1)

    # Case 2: single full-block path (N <= tile width), no masking.
    args2 = make_inputs(k2, 32, 256)
    out2 = jax.block_until_ready(variational_loss(*args2, tn=512))
    ref2 = reference_variational_loss(*args2)

    for (neg_elbo, entropy), (ref_neg_elbo, ref_entropy) in ((out1, ref1),
                                                             (out2, ref2)):
        assert jnp.allclose(neg_elbo, ref_neg_elbo, rtol=2e-5, atol=1e-3), (
            neg_elbo, ref_neg_elbo)
        assert jnp.allclose(entropy, ref_entropy, rtol=2e-5, atol=1e-4), (
            entropy, ref_entropy)

    print("KERNEL_OK")
</pallas_src>

<mosaic_0001>
module attributes {stable_mosaic.version = 11 : i64} {
  func.func @kernel(%arg0: i32, %arg1: memref<32x256xf32, #tpu.memory_space<vmem>>, %arg2: memref<1x256xf32, #tpu.memory_space<vmem>>, %arg3: memref<1x32xf32, #tpu.memory_space<vmem>>, %arg4: memref<1x32xf32, #tpu.memory_space<vmem>>, %arg5: memref<1x32xf32, #tpu.memory_space<vmem>>, %arg6: memref<1xf32, #tpu.memory_space<smem>>, %arg7: memref<1xf32, #tpu.memory_space<smem>>, %arg8: memref<1x32xf32, #tpu.memory_space<vmem>>, %arg9: memref<2xf32, #tpu.memory_space<smem>>) attributes {dimension_semantics = [#tpu.dimension_semantics<arbitrary>], iteration_bounds = array<i64: 3>, scalar_prefetch = 0 : i64, scratch_operands = 2 : i64, tpu.core_type = #tpu.core_type<tc>, window_params = [{transform_indices = @transform_0, window_bounds = array<i64: 32, 256>}, {transform_indices = @transform_1, window_bounds = array<i64: 1, 256>}, {pipeline_mode = #tpu.pipeline_mode<synchronous>, transform_indices = @transform_2, window_bounds = array<i64: 1, 32>}, {pipeline_mode = #tpu.pipeline_mode<synchronous>, transform_indices = @transform_3, window_bounds = array<i64: 1, 32>}, {pipeline_mode = #tpu.pipeline_mode<synchronous>, transform_indices = @transform_4, window_bounds = array<i64: 1, 32>}, {transform_indices = @transform_5, window_bounds = array<i64: 1>}, {transform_indices = @transform_6, window_bounds = array<i64: 1>}]} {
    %c0_i32 = arith.constant 0 : i32
    %0 = arith.cmpi eq, %arg0, %c0_i32 : i32
    %1 = arith.extui %0 : i1 to i32
    %c0_i32_0 = arith.constant 0 : i32
    %2 = arith.cmpi ne, %1, %c0_i32_0 : i32
    scf.if %2 {
      %c0_11 = arith.constant 0 : index
      %c0_12 = arith.constant 0 : index
      %29 = vector.load %arg4[%c0_11, %c0_12] : memref<1x32xf32, #tpu.memory_space<vmem>>, vector<1x32xf32>
      %c0_13 = arith.constant 0 : index
      %c0_14 = arith.constant 0 : index
      %30 = vector.load %arg3[%c0_13, %c0_14] : memref<1x32xf32, #tpu.memory_space<vmem>>, vector<1x32xf32>
      %31 = math.exp %29 : vector<1x32xf32>
      %c0_15 = arith.constant 0 : index
      %c0_16 = arith.constant 0 : index
      %32 = vector.load %arg5[%c0_15, %c0_16] : memref<1x32xf32, #tpu.memory_space<vmem>>, vector<1x32xf32>
      %33 = arith.mulf %31, %32 : vector<1x32xf32>
      %34 = arith.addf %30, %33 : vector<1x32xf32>
      %c0_17 = arith.constant 0 : index
      %c0_18 = arith.constant 0 : index
      %35 = vector.load %arg8[%c0_17, %c0_18] : memref<1x32xf32, #tpu.memory_space<vmem>>, vector<1x32xf32>
      tpu.vector_store %arg8[%c0_17, %c0_18], %34 {strides = array<i32>} : memref<1x32xf32, #tpu.memory_space<vmem>>, vector<1x32xf32>,
      %36 = vector.shape_cast %29 : vector<1x32xf32> to vector<1x1x32xf32>
      %cst_19 = arith.constant dense<0.000000e+00> : vector<1xf32>
      %37 = vector.multi_reduction <add>, %36, %cst_19 [1, 2] : vector<1x1x32xf32> to vector<1xf32>
      %38 = vector.shape_cast %37 : vector<1xf32> to vector<1x1x1xf32>
      %39 = vector.extract %38[0, 0, 0] : f32 from vector<1x1x1xf32>
      %cst_20 = arith.constant 45.4060326 : f32
      %40 = arith.addf %cst_20, %39 : f32
      %41 = arith.mulf %34, %34 : vector<1x32xf32>
      %42 = vector.shape_cast %41 : vector<1x32xf32> to vector<1x1x32xf32>
      %cst_21 = arith.constant dense<0.000000e+00> : vector<1xf32>
      %43 = vector.multi_reduction <add>, %42, %cst_21 [1, 2] : vector<1x1x32xf32> to vector<1xf32>
      %44 = vector.shape_cast %43 : vector<1xf32> to vector<1x1x1xf32>
      %45 = vector.extract %44[0, 0, 0] : f32 from vector<1x1x1xf32>
      %cst_22 = arith.constant -5.000000e-01 : f32
      %46 = arith.mulf %cst_22, %45 : f32
      %cst_23 = arith.constant 29.4060326 : f32
      %47 = arith.subf %46, %cst_23 : f32
      %c0_24 = arith.constant 0 : index
      %48 = memref.load %arg7[%c0_24] : memref<1xf32, #tpu.memory_space<smem>>
      memref.store %40, %arg7[%c0_24] : memref<1xf32, #tpu.memory_space<smem>>
      %49 = arith.addf %47, %40 : f32
      %c0_25 = arith.constant 0 : index
      %50 = memref.load %arg9[%c0_25] : memref<2xf32, #tpu.memory_space<smem>>
      memref.store %49, %arg9[%c0_25] : memref<2xf32, #tpu.memory_space<smem>>
      %cst_26 = arith.constant 0.000000e+00 : f32
      %c1_27 = arith.constant 1 : index
      %51 = memref.load %arg9[%c1_27] : memref<2xf32, #tpu.memory_space<smem>>
      memref.store %cst_26, %arg9[%c1_27] : memref<2xf32, #tpu.memory_space<smem>>
    } else {
    }
    %c0 = arith.constant 0 : index
    %c0_1 = arith.constant 0 : index
    %3 = vector.load %arg8[%c0, %c0_1] : memref<1x32xf32, #tpu.memory_space<vmem>>, vector<1x32xf32>
    %c0_2 = arith.constant 0 : index
    %c0_3 = arith.constant 0 : index
    %4 = vector.load %arg1[%c0_2, %c0_3] : memref<32x256xf32, #tpu.memory_space<vmem>>, vector<32x256xf32>
    %cst = arith.constant dense<0.000000e+00> : vector<1x256xf32>
    %5 = tpu.matmul %3, %4, %cst {dimension_numbers = #tpu.dot_dimension_numbers<[1], [0], [0], [1], [0, 0, 1, 1], [], []>} : vector<1x32xf32>, vector<32x256xf32>, vector<1x256xf32> -> vector<1x256xf32>
    %c0_4 = arith.constant 0 : index
    %c0_5 = arith.constant 0 : index
    %6 = vector.load %arg2[%c0_4, %c0_5] : memref<1x256xf32, #tpu.memory_space<vmem>>, vector<1x256xf32>
    %7 = arith.subf %6, %5 : vector<1x256xf32>
    %cst_6 = arith.constant 1.000000e+00 : f32
    %8 = vector.broadcast %cst_6 : f32 to vector<1x256xf32>
    %9 = arith.mulf %7, %8 : vector<1x256xf32>
    %10 = tpu.iota {dimensions = array<i32: 1>} : vector<1x256xi32>
    %c256_i32 = arith.constant 256 : i32
    %11 = arith.muli %arg0, %c256_i32 : i32
    %12 = vector.broadcast %11 : i32 to vector<1x256xi32>
    %13 = arith.addi %12, %10 : vector<1x256xi32>
    %c640_i32 = arith.constant 640 : i32
    %14 = vector.broadcast %c640_i32 : i32 to vector<1x256xi32>
    %15 = arith.cmpi slt, %13, %14 : vector<1x256xi32>
    %cst_7 = arith.constant 0.000000e+00 : f32
    %16 = vector.broadcast %cst_7 : f32 to vector<1x256xf32>
    %17 = arith.select %15, %9, %16 : vector<1x256xi1>, vector<1x256xf32>
    %c1 = arith.constant 1 : index
    %18 = memref.load %arg9[%c1] : memref<2xf32, #tpu.memory_space<smem>>
    %19 = arith.mulf %17, %17 : vector<1x256xf32>
    %20 = vector.shape_cast %19 : vector<1x256xf32> to vector<1x1x256xf32>
    %cst_8 = arith.constant dense<0.000000e+00> : vector<1xf32>
    %21 = vector.multi_reduction <add>, %20, %cst_8 [1, 2] : vector<1x1x256xf32> to vector<1xf32>
    %22 = vector.shape_cast %21 : vector<1xf32> to vector<1x1x1xf32>
    %23 = vector.extract %22[0, 0, 0] : f32 from vector<1x1x1xf32>
    %24 = arith.addf %18, %23 : f32
    %c1_9 = arith.constant 1 : index
    %25 = memref.load %arg9[%c1_9] : memref<2xf32, #tpu.memory_space<smem>>
    memref.store %24, %arg9[%c1_9] : memref<2xf32, #tpu.memory_space<smem>>
    %c2_i32 = arith.constant 2 : i32
    %26 = arith.cmpi eq, %arg0, %c2_i32 : i32
    %27 = arith.extui %26 : i1 to i32
    %c0_i32_10 = arith.constant 0 : i32
    %28 = arith.cmpi ne, %27, %c0_i32_10 : i32
    scf.if %28 {
      %c1_11 = arith.constant 1 : index
      %29 = memref.load %arg9[%c1_11] : memref<2xf32, #tpu.memory_space<smem>>
      %cst_12 = arith.constant -5.000000e-01 : f32
      %30 = arith.mulf %cst_12, %29 : f32
      %cst_13 = arith.constant 588.120667 : f32
      %31 = arith.subf %30, %cst_13 : f32
      %c0_14 = arith.constant 0 : index
      %32 = memref.load %arg9[%c0_14] : memref<2xf32, #tpu.memory_space<smem>>
      %33 = arith.addf %32, %31 : f32
      %cst_15 = arith.constant 0.000000e+00 : f32
      %34 = arith.subf %cst_15, %33 : f32
      %c0_16 = arith.constant 0 : index
      %35 = memref.load %arg6[%c0_16] : memref<1xf32, #tpu.memory_space<smem>>
      memref.store %34, %arg6[%c0_16] : memref<1xf32, #tpu.memory_space<smem>>
    } else {
    }
    return
  }
  func.func @transform_0(%arg0: i32) -> (i32, i32) {
    %c0_i32 = arith.constant 0 : i32
    %c0_i32_0 = arith.constant 0 : i32
    return %c0_i32, %arg0 : i32, i32
  }
  func.func @transform_1(%arg0: i32) -> (i32, i32) {
    %c0_i32 = arith.constant 0 : i32
    %c0_i32_0 = arith.constant 0 : i32
    return %c0_i32, %arg0 : i32, i32
  }
  func.func @transform_2(%arg0: i32) -> (i32, i32) {
    %c0_i32 = arith.constant 0 : i32
    %c0_i32_0 = arith.constant 0 : i32
    %c0_i32_1 = arith.constant 0 : i32
    return %c0_i32, %c0_i32_0 : i32, i32
  }
  func.func @transform_3(%arg0: i32) -> (i32, i32) {
    %c0_i32 = arith.constant 0 : i32
    %c0_i32_0 = arith.constant 0 : i32
    %c0_i32_1 = arith.constant 0 : i32
    return %c0_i32, %c0_i32_0 : i32, i32
  }
  func.func @transform_4(%arg0: i32) -> (i32, i32) {
    %c0_i32 = arith.constant 0 : i32
    %c0_i32_0 = arith.constant 0 : i32
    %c0_i32_1 = arith.constant 0 : i32
    return %c0_i32, %c0_i32_0 : i32, i32
  }
  func.func @transform_5(%arg0: i32) -> i32 {
    %c0_i32 = arith.constant 0 : i32
    %c0_i32_0 = arith.constant 0 : i32
    return %c0_i32 : i32
  }
  func.func @transform_6(%arg0: i32) -> i32 {
    %c0_i32 = arith.constant 0 : i32
    %c0_i32_0 = arith.constant 0 : i32
    return %c0_i32 : i32
  }
}

</mosaic_0001>

<bundles_post_ra>
// kernel: tpu_custom_call.1
= control target key start
LH: loop header
LB: loop body
LE: loop exit
PB: predicated region body
PF: predicated region fallthrough
CT: control target
= control target key end

     0   :  { %12 = vsyncpa [#allocation5], 0  ;;  %s1121_s0 = inlined_call_operand.hbm [shape: f32[32,640], index: 0, kind: input, shape index: {}]   ;;  %s1122_s1 = inlined_call_operand.hbm [shape: f32[1,640], index: 1, kind: input, shape index: {}]   ;;  %s1123_s2 = inlined_call_operand.vmem [shape: f32[1,32], index: 2, kind: input, shape index: {}]   ;;  %s1124_s3 = inlined_call_operand.vmem [shape: f32[1,32], index: 3, kind: input, shape index: {}]   ;;  %s1125_s4 = inlined_call_operand.vmem [shape: f32[1,32], index: 4, kind: input, shape index: {}]   ;;  %s1126_s5 = inlined_call_operand.hbm [shape: f32[1], index: 5, kind: output, shape index: {0}]   ;;  %s1127_s6 = inlined_call_operand.hbm [shape: f32[1], index: 6, kind: output, shape index: {1}]  }
   0x1   :  { %14 = vsyncpa [#allocation5 + $0x1], 0 }
   0x2   :  { %15 = vsyncpa [#allocation8], 0 }
   0x3   :  { %17 = vsyncpa [#allocation8 + $0x1], 0 }
   0x4   :  { %18 = vsyncpa [#allocation6], 0 }
   0x5   :  { %19 = vsyncpa [#allocation11], 0  ;;  %s898_s21 = smov 0   ;;  %s900_s22 = smov 0  }
   0x6   :  { %s902_s23 = smov 0   ;;  %s904_s24 = smov 0  }
   0x7 LB: > { %s917_s25 = sadd.s32 4294967295, %s852_s24   ;;  %s920_s26 = sadd.s32 1, %s852_s24   ;;  %s852_s24 = sphi %s904_s24, %s1135_s24   ;;  %s848_s23 = sphi %s902_s23, %s1134_s23   ;;  %s844_s22 = sphi %s900_s22, %s1133_s22   ;;  %s840_s21 = sphi %s898_s21, %s1132_s21  }
   0x8   : > { %s29_s27 = ssub.s32 %s852_s24, %s920_s26  ;;  %s32_s28 = sadd.s32 1, %s848_s23 }
   0x9   : > { %p30_p0 = scmp.eq.s32.totalorder %s29_s27, 0  ;;  %p39_p1 = scmp.ne.s32.totalorder %s848_s23, %s844_s22 }
   0xa   : > { %p40_p2 = scmp.eq.s32.totalorder %s852_s24, 0  ;;  %p45_p3 = scmp.ne.s32.totalorder %s844_s22, %s840_s21 }
   0xb   : > { %s930_s29 = scalar_select %p30_p0, %s848_s23, %s32_s28  }
   0xc   : > { %p932_p4 = por %p40_p2, %p39_p1  ;;  %p46_p5 = scmp.eq.s32.totalorder %s917_s25, 0 }
   0xd   : > { %p619_p7 = scmp.ge.s32.totalorder %s852_s24, 3 }
   0xe   : > { %p937_p6 = por %p46_p5, %p45_p3 }
   0xf   : > { %205 = sbr.rel (%p619_p7) target bundleno = 91 (0x5b), region = 28 }
  0x10   : > { %s1130_s7 = scalar_select %p937_p6, 1, 0 }
  0x16   : > { %208 = sbr.rel (!%p932_p4) target bundleno = 57 (0x39), region = 32  ;;  %s209_s8 = sand.u32 (%p932_p4), 1, %s848_s23  }
  0x17   : > { %s621_s9 = sshll.u32 (%p932_p4), %s852_s24, 1  ;;  %s620_s10 = sshll.u32 (%p932_p4), %s209_s8, 6 }
  0x18   : > { %s215_s11 = ssub.s32 (%p932_p4), 5, %s621_s9  ;;  %s952_s14 = scalar_lea.sflag (%p932_p4), [#allocation5], %s209_s8 }
  0x19   : > { %p216_p8 = scmp.lt.s32.totalorder (%p932_p4), %s215_s11, 2  ;;  %s213_s15 = scalar_lea.vmem (%p932_p4), [#allocation4], %s620_s10 }
  0x1d   : > { %s1137_s11 = smov (!%p216_p8, %s215_s11), 2 }
  0x1e   : > { %s949_s12 = sshll.u32 %s1137_s11, 9 }
  0x1f   : > { %s220_s13 = ssub.s32 1024, %s949_s12 }
  0x20   : > { %221 = vsyncadd %s952_s14, %s220_s13  ;;  %p623_p9 = scmp.ne.s32.totalorder %s949_s12, 0  ;;  %s650_s16 = sshll.u32 %s852_s24, 8 }
  0x21   : > { %s960_s19 = scalar_lea.hbm %s1121_s0, %s650_s16  ;;  %s625_s20 = sshll.u32 %s1137_s11, 3 }
  0x22   : > { %s227_s21 = sshll.u32 %s213_s15, 4  ;;  %s726_s27 = scalar_lea.hbm %s960_s19, %s949_s12  ;;  %s963_s21 = int_to_ptr.vmem [resolvable:$true] %s227_s21 }
  0x23   : > { %p727_p10 = scmp.ne.s32.totalorder %s960_s19, %s726_s27  ;;  %s730_s9 = scalar_lea.hbm %s1121_s0, 2560 }
  0x24   : > { %p731_p13 = scmp.lt.u32.totalorder %s960_s19, %s1121_s0  ;;  %p732_p0 = scmp.lt.u32.totalorder %s730_s9, %s726_s27 }
  0x25   : > { %p728_p11 = pnand %p727_p10, %p623_p9  ;;  %p734_p2 = scmp.lt.u32.totalorder %s726_s27, %s960_s19 }
  0x26   : > { %p733_p1 = por %p732_p0, %p731_p13 }
  0x27   : > { %p729_p12 = pneg %p728_p11 }
  0x28   : > { %p735_p3 = por %p734_p2, %p733_p1 }
  0x2a   : > { %p736_p5 = pnand %p735_p3, %p729_p12 }
  0x2c   : > { %739 = shalt.err (!%p736_p5)
}
  0x2d   : > { %s740_s15 = scalar_lea.vmem %s963_s21, %s949_s12  ;;  %s854_s16 = smov [#allocation4]  }
  0x2e   : > { %p741_p7 = scmp.ne.s32.totalorder %s963_s21, %s740_s15  ;;  %s744_s17 = sshll.u32 %s854_s16, 4  ;;  %s745_s17 = int_to_ptr.vmem [resolvable:$false] %s744_s17 }
  0x2f   : > { %s746_s18 = scalar_lea.vmem %s745_s17, 2048  ;;  %p747_p11 = scmp.lt.s32.totalorder %s963_s21, %s745_s17 }
  0x30   : > { %p742_p8 = pnand %p741_p7, %p623_p9  ;;  %p748_p13 = scmp.lt.s32.totalorder %s746_s18, %s740_s15 }
  0x32   : > { %p743_p10 = pneg %p742_p8  ;;  %p749_p0 = por %p748_p13, %p747_p11 }
  0x34   : > { %p750_p1 = pnand %p749_p0, %p743_p10 }
  0x36   : > { %753 = shalt.err (!%p750_p1)
}
  0x37   : > { %s855_s27 = smov 640   ;;  %s856_s28 = smov 256  }
  0x38   : > { %233 = dma.hbm_to_vmem [thread:$0]  (%p623_p9), %s960_s19, %s949_s12, %s963_s21, %s952_s14, %s855_s27, %s856_s28, %s625_s20  }
  0x39 PF: > { %236 = sbr.rel (!%p932_p4) target bundleno = 91 (0x5b), region = 36  ;;  %s237_s8 = sand.u32 (%p932_p4), 1, %s848_s23  }
  0x3a   : > { %s629_s9 = sshll.u32 (%p932_p4), %s852_s24, 1  ;;  %s628_s10 = sshll.u32 (%p932_p4), %s237_s8, 1 }
  0x3b   : > { %s243_s13 = ssub.s32 (%p932_p4), 5, %s629_s9  ;;  %s999_s17 = scalar_lea.sflag (%p932_p4), [#allocation8], %s237_s8 }
  0x3c   : > { %p244_p12 = scmp.lt.s32.totalorder (%p932_p4), %s243_s13, 2  ;;  %s241_s11 = scalar_lea.vmem (%p932_p4), [#allocation7], %s628_s10 }
  0x40   : > { %s1139_s13 = smov (!%p244_p12, %s243_s13), 2 }
  0x41   : > { %s996_s15 = sshll.u32 %s1139_s13, 4 }
  0x42   : > { %s248_s16 = ssub.s32 32, %s996_s15 }
  0x43   : > { %249 = vsyncadd %s999_s17, %s248_s16  ;;  %p631_p4 = scmp.ne.s32.totalorder %s996_s15, 0  ;;  %s653_s30 = sshll.u32 %s852_s24, 5 }
  0x44   : > { %s1007_s19 = scalar_lea.hbm %s1122_s1, %s653_s30  ;;  %s254_s20 = sshll.u32 %s241_s11, 4  ;;  %s255_s20 = int_to_ptr.vmem [resolvable:$true] %s254_s20 }
  0x45   : > { %s754_s21 = scalar_lea.hbm %s1007_s19, %s996_s15  ;;  %s758_s28 = scalar_lea.hbm %s1122_s1, 80 }
  0x46   : > { %p755_p9 = scmp.ne.s32.totalorder %s1007_s19, %s754_s21  ;;  %p759_p5 = scmp.lt.u32.totalorder %s1007_s19, %s1122_s1 }
  0x47   : > { %p760_p7 = scmp.lt.u32.totalorder %s758_s28, %s754_s21  ;;  %p762_p10 = scmp.lt.u32.totalorder %s754_s21, %s1007_s19 }
  0x48   : > { %p756_p2 = pnand %p755_p9, %p631_p4 }
  0x49   : > { %p761_p8 = por %p760_p7, %p759_p5 }
  0x4a   : > { %p757_p3 = pneg %p756_p2 }
  0x4b   : > { %p763_p11 = por %p762_p10, %p761_p8 }
  0x4d   : > { %p764_p13 = pnand %p763_p11, %p757_p3 }
  0x4f   : > { %767 = shalt.err (!%p764_p13)
}
  0x50   : > { %s768_s10 = scalar_lea.vmem %s255_s20, %s996_s15  ;;  %s857_s13 = smov [#allocation7]  }
  0x51   : > { %p769_p0 = scmp.ne.s32.totalorder %s255_s20, %s768_s10  ;;  %s772_s16 = sshll.u32 %s857_s13, 4  ;;  %s773_s16 = int_to_ptr.vmem [resolvable:$false] %s772_s16 }
  0x52   : > { %s774_s11 = scalar_lea.vmem %s773_s16, 64  ;;  %p775_p9 = scmp.lt.s32.totalorder %s255_s20, %s773_s16 }
  0x53   : > { %p770_p1 = pnand %p769_p0, %p631_p4  ;;  %p776_p2 = scmp.lt.s32.totalorder %s774_s11, %s768_s10 }
  0x55   : > { %p771_p12 = pneg %p770_p1  ;;  %p777_p6 = por %p776_p2, %p775_p9 }
  0x57   : > { %p778_p5 = pnand %p777_p6, %p771_p12 }
  0x59   : > { %781 = shalt.err (!%p778_p5)
}
  0x5a   : > { %257 = dma.hbm_to_vmem [thread:$0]  (%p631_p4), %s1007_s19, %s996_s15, %s255_s20, %s999_s17  }
  0x5b PF: > { %p633_p3 = scmp.ge.s32.totalorder %s852_s24, 1  ;;  %p259_p7 = scmp.lt.s32.totalorder %s852_s24, 4 }
  0x5d   : > { %p260_p8 = pnand %p633_p3, %p259_p7 }
  0x5e   : > { %s265_s30 = sand.u32 (!%p260_p8), 1, %s844_s22   ;;  %p1131_p6 = scmp.ne.s32.totalorder (!%p260_p8), %s1130_s7, 0 }
  0x5f   : > { %263 = sbr.rel (%p260_p8) target bundleno = 802 (0x322), region = 40  ;;  %s634_s12 = sshll.u32 (!%p260_p8), %s265_s30, 6 }
  0x60   : > { %s266_s14 = scalar_lea.sflag (!%p260_p8), [#allocation5], %s265_s30  ;;  %s1033_s21 = scalar_lea.vmem (!%p260_p8), [#allocation4], %s634_s12 }
  0x66   : > { %823 = dma.done.wait (%p1131_p6), %s266_s14, 1024  }
  0x67   : > { %825 = vsyncadd (%p1131_p6), %s266_s14, 4294966272  ;;  %s635_s15 = sshll.u32 %s265_s30, 1  ;;  %s275_s17 = scalar_lea.sflag [#allocation8], %s265_s30 }
  0x68   : > { %s1039_s19 = scalar_lea.vmem [#allocation7], %s635_s15 }
  0x69   : > { %827 = dma.done.wait (%p1131_p6), %s275_s17, 32  }
  0x6a   : > { %829 = vsyncadd (%p1131_p6), %s275_s17, 4294967264  ;;  %p636_p4 = scmp.ne.s32.totalorder %s917_s25, 0 }
  0x6b   : > { %v321_v0 = vld [vmem:[%s1124_s3] sm:$0x1] (!%p636_p4)  ;;  %vm328_vm0 = vcmask (!%p636_p4), 253952   ;;  %s858_s8 = smov (!%p636_p4), 0.0  }
  0x6c   : > { %320 = sbr.rel (%p636_p4) target bundleno = 339 (0x153), region = 52  ;;  %v323_v1 = vmul.f32 (!%p636_p4), 1.442695, %v321_v0  ;;  %v330_v2 = vsel (!%p636_p4), %vm328_vm0, %v321_v0, 0.0  ;;  %v325_v3 = vld [vmem:[%s1125_s4] sm:$0x1] (!%p636_p4) }
  0x6d   : > { %331 = vadd.xlane.f32.xlu0 (!%p636_p4), %v330_v2  ;;  %v322_v5 = vld [vmem:[%s1123_s2] sm:$0x1] (!%p636_p4)  ;;  %360 = sst [smem:[#allocation3 + $0x1]] (!%p636_p4), %s858_s8 }
  0x6e   : > { %724 = vpow2.f32 (!%p636_p4), %v323_v1 }
  0x78   : > { %v725_v4 = vpop.eup %724 }
  0x79   : > { %v326_v6 = vmul.f32 %v725_v4, %v325_v3 }
  0x7b   : > { %v327_v7 = vadd.f32 %v326_v6, %v322_v5 }
  0x7d   : > { %329 = vst.msk [vmem:[#allocation2] sm:$0x1] %vm328_vm0, %v327_v7  ;;  %v341_v8 = vmul.f32 %v327_v7, %v327_v7 }
  0x7f   : > { %v342_v9 = vsel %vm328_vm0, %v341_v8, 0.0 }
  0x80   : > { %343 = vadd.xlane.f32.xlu0 %v342_v9 }
  0xfa   : > { %v332_v10 = vpop.xlane.xlu0 %331 }
  0xfb   : > { %v333_v11 = vrot.slane %v332_v10, 4 }
  0xfd   : > { %v334_v12 = vadd.f32 %v333_v11, %v332_v10 }
  0xff   : > { %v335_v13 = vrot.slane %v334_v12, 2 }
 0x101   : > { %v336_v14 = vadd.f32 %v335_v13, %v334_v12 }
 0x103   : > { %v337_v15 = vrot.slane %v336_v14, 1 }
 0x105   : > { %v338_v16 = vadd.f32 %v337_v15, %v336_v14 }
 0x107   : > { %662 = vpush %v338_v16 }
 0x10d   : > { %v344_v17 = vpop.xlane.xlu0 %343 }
 0x10e   : > { %v345_v18 = vrot.slane %v344_v17, 4 }
 0x110   : > { %v346_v19 = vadd.f32 %v345_v18, %v344_v17 }
 0x112   : > { %v347_v20 = vrot.slane %v346_v19, 2 }
 0x114   : > { %v348_v21 = vadd.f32 %v347_v20, %v346_v19 }
 0x116   : > { %v349_v22 = vrot.slane %v348_v21, 1 }
 0x118   : > { %v350_v23 = vadd.f32 %v349_v22, %v348_v21 }
 0x11a   : > { %664 = vpush %v350_v23 }
 0x138   : > { %s663_s9 = spop %662 }
 0x139   : > { %s340_s10 = sadd.f32 45.406033, %s663_s9 }
 0x13b   : > { %355 = sst [smem:[#allocation10]] %s340_s10 }
 0x14b   : > { %s665_s13 = spop %664 }
 0x14c   : > { %s352_s16 = smul.f32 -0.5, %s665_s13 }
 0x14e   : > { %s637_s11 = sadd.f32 -29.406033, %s352_s16 }
 0x150   : > { %s356_s30 = sadd.f32 %s637_s11, %s340_s10 }
 0x152   : > { %358 = sst [smem:[#allocation3]] %s356_s30 }
 0x153 PF: > { %v363_v24 = vld [vmem:[%s1033_s21 + $0x8] sm:$0xff]  ;;  %v365_v25 = vld [vmem:[%s1033_s21 + $0x18] sm:$0xff]  ;;  %v362_v26 = vld [vmem:[%s1033_s21] sm:$0xff]  ;;  %v859_v31 = vmov 0.0   ;;  %vm370_vm1 = vcmask 261120   ;;  %v452_v40 = vlaneseq  ;;  %s639_s12 = sshll.u32 %s917_s25, 8 }
 0x154   : > { %v654_v27 = vpack.c.bf16 %v365_v25, %v363_v24  ;;  %v364_v28 = vld [vmem:[%s1033_s21 + $0x10] sm:$0xff]  ;;  %v367_v29 = vld [vmem:[%s1033_s21 + $0x28] sm:$0xff]  ;;  %v369_v30 = vld [vmem:[%s1033_s21 + $0x38] sm:$0xff]  ;;  %438 = vmatprep.mubr.f32.mxu0 %v859_v31  ;;  %v860_v38 = vmov 1966171168   ;;  %v469_v49 = vstv %s639_s12  ;;  %vm490_vm4 = vcmask 1040384  }
 0x155   : > { %v656_v32 = vpack.c.bf16 %v364_v28, %v362_v26  ;;  %v658_v33 = vpack.c.bf16 %v369_v30, %v367_v29  ;;  %v366_v34 = vld [vmem:[%s1033_s21 + $0x20] sm:$0xff]  ;;  %v368_v35 = vld [vmem:[%s1033_s21 + $0x30] sm:$0xff]  ;;  %v361_v37 = vld [vmem:[#allocation2] sm:$0x1]  ;;  %v450_v39 = vunpack.c.l.s4 %v860_v38  ;;  %v453_v42 = vshrl.u32 %v452_v40, 7  ;;  %p680_p10 = scmp.eq.s32.totalorder %s917_s25, 2 }
 0x156   : > { %655 = vmatprep.subr.bf16.mxu0 %v654_v27  ;;  %v660_v36 = vpack.c.bf16 %v368_v35, %v366_v34  ;;  %v466_v43 = vand.u32 127, %v452_v40  ;;  %v445_v51 = vld [vmem:[%s1039_s19] sm:$0x3]  ;;  %s782_s15 = scalar_lea.hbm %s1127_s6, 16 }
 0x157   : > { %657 = vmatpush1.bf16.msra.mxu0 %v656_v32  ;;  %v451_v41 = vunpack.c.0.s8 %v450_v39  ;;  %v477_v55 = vsub.s32 0, %v453_v42  ;;  %v481_v56 = vsub.s32 1, %v453_v42  ;;  %p783_p11 = scmp.ne.s32.totalorder %s1127_s6, %s782_s15  ;;  %p788_p1 = scmp.lt.u32.totalorder %s782_s15, %s1127_s6 }
 0x158   : > { %659 = vmatprep.subr.bf16.mxu0 %v658_v33  ;;  %v467_v47 = vadd.s32 128, %v466_v43  ;;  %v470_v52 = vadd.s32 %v469_v49, %v466_v43 }
 0x159   : > { %v454_v45 = vsub.s32 %v451_v41, %v453_v42  ;;  %p784_p13 = pnand %p783_p11, %p680_p10 }
 0x15a   : > { %v471_v53 = vadd.s32 %v469_v49, %v467_v47  ;;  %vm472_vm2 = vcmp.lt.s32.totalorder %v470_v52, 640 }
 0x15b   : > { %661 = vmatpush1.bf16.msra.mxu0 %v660_v36  ;;  %p785_p0 = pneg %p784_p13 }
 0x15c   : > { %vm473_vm3 = vcmp.lt.s32.totalorder %v471_v53, 640 }
 0x15d   : > { %p790_p12 = pnand %p788_p1, %p785_p0 }
 0x15e   : > { %638 = vmatmul.mubr.msk.f32.vlgmr.msra.gmra.mrb[0].mxu0 %vm370_vm1, %v361_v37 }
 0x231   : > { %v440_v44 = vpop.f32.mrb[0].mxu0 }
 0x232   : > { %v442_v46 = vpop.f32.mrb[1].mxu0 }
 0x233   : > { %v448_v48 = vcombine.low %v440_v44, %v442_v46 }
 0x235   : > { %v455_v50 = vrot.slane %v448_v48, %v454_v45 }
 0x237   : > { %v462_v54 = vrot.slane %v455_v50, %v454_v45 }
 0x239   : > { %v464_v57 = vsub.f32 %v445_v51, %v462_v54 }
 0x23b   : > { %v478_v58 = vrot.slane %v464_v57, %v477_v55  ;;  %v482_v59 = vrot.slane %v464_v57, %v481_v56 }
 0x23d   : > { %v485_v60 = vsel %vm472_vm2, %v478_v58, 0.0  ;;  %v486_v61 = vsel %vm473_vm3, %v482_v59, 0.0 }
 0x23e   : > { %v488_v62 = vmul.f32 %v485_v60, %v485_v60  ;;  %v489_v63 = vmul.f32 %v486_v61, %v486_v61 }
 0x240   : > { %v491_v0 = vsel %vm490_vm4, %v488_v62, 0.0  ;;  %v492_v1 = vsel %vm490_vm4, %v489_v63, 0.0 }
 0x241   : > { %v493_v2 = vadd.f32 %v492_v1, %v491_v0 }
 0x243   : > { %494 = vadd.xlane.f32.xlu0 %v493_v2 }
 0x244   : > { %793 = shalt.err (!%p790_p12)
}
 0x245   : > { %s861_s18 = smov [#allocation10]   ;;  %s640_s7 = sld [smem:[#allocation3 + $0x1]] }
 0x246   : > { %675 = dma.smem_to_hbm (%p680_p10), %s861_s18, 16, %s1127_s6, [#allocation11]  }
 0x247   : > { %s513_s8 = sld [smem:[#allocation3]]  ;;  %s794_s21 = scalar_lea.hbm %s1126_s5, 16 }
 0x248   : > { %p795_p9 = scmp.ne.s32.totalorder %s1126_s5, %s794_s21  ;;  %p800_p3 = scmp.lt.u32.totalorder %s794_s21, %s1126_s5 }
 0x24a   : > { %p796_p2 = pnand %p795_p9, %p680_p10 }
 0x24c   : > { %p797_p5 = pneg %p796_p2 }
 0x24e   : > { %p802_p7 = pnand %p800_p3, %p797_p5 }
 0x2d0   : > { %v495_v3 = vpop.xlane.xlu0 %494 }
 0x2d1   : > { %v496_v4 = vrot.slane %v495_v3, 4 }
 0x2d3   : > { %v497_v5 = vadd.f32 %v496_v4, %v495_v3 }
 0x2d5   : > { %v498_v6 = vrot.slane %v497_v5, 2 }
 0x2d7   : > { %v499_v7 = vadd.f32 %v498_v6, %v497_v5 }
 0x2d9   : > { %v500_v8 = vrot.slane %v499_v7, 1 }
 0x2db   : > { %v501_v9 = vadd.f32 %v500_v8, %v499_v7 }
 0x2dd   : > { %666 = vpush %v501_v9 }
 0x30e   : > { %s667_s9 = spop %666 }
 0x30f   : > { %s503_s10 = sadd.f32 %s667_s9, %s640_s7 }
 0x311   : > { %505 = sst [smem:[#allocation3 + $0x1]] %s503_s10  ;;  %s511_s13 = smul.f32 -0.5, %s503_s10 }
 0x313   : > { %s643_s16 = sadd.f32 -588.12067, %s511_s13 }
 0x315   : > { %s514_s11 = sadd.f32 %s643_s16, %s513_s8 }
 0x317   : > { %s515_s30 = ssub.f32 0.0, %s514_s11 }
 0x319   : > { %671 = sst [smem:[#allocation9]] (%p680_p10), %s515_s30 }
 0x31a   : > { %805 = shalt.err (!%p802_p7)
}
 0x31b   : > { %s862_s20 = smov [#allocation9]  }
 0x31c   : > { %673 = dma.smem_to_hbm (%p680_p10), %s862_s20, 16, %s1126_s5, [#allocation6]  }
 0x31d   : > { %831 = dma.done.wait (%p680_p10), [#allocation6], 16  }
 0x31e   : > { %833 = vsyncadd (%p680_p10), [#allocation6], 4294967280 }
 0x31f   : > { %835 = dma.done.wait (%p680_p10), [#allocation11], 16  }
 0x320   : > { %837 = vsyncadd (%p680_p10), [#allocation11], 4294967280 }
 0x321   : > { %544 = sfence }
 0x322 PF: > { %p22_p8 = scmp.ge.s32.totalorder %s920_s26, 5   ;;  %s1132_s21 = smov %s844_s22 }
 0x323   : > { %s1133_s22 = smov %s848_s23  ;;  %s1134_s23 = smov %s930_s29 }
 0x324   : > { %s1135_s24 = smov %s920_s26  ;;  %24 = sbr.rel (!%p22_p8) target bundleno = 7 (0x7), region = 111 }
 0x32b   :  { %550 = vsyncpa [#allocation5], 1 }
 0x32c   :  { %552 = vsyncpa [#allocation5 + $0x1], 1 }
 0x32d   :  { %553 = vsyncpa [#allocation8], 1 }
 0x32e   :  { %555 = vsyncpa [#allocation8 + $0x1], 1 }
 0x32f   :  { %556 = vsyncpa [#allocation6], 1 }
 0x330   :  { %558 = vsyncpa [#allocation6 + $0x1], 1 }
 0x331   :  { %559 = vsyncpa [#allocation11], 1 }

</bundles_post_ra>
